<compile_context>
chip_gen: v7x
topology: tpu7x:2x2x1
jax: 0.10.0
libtpu: 0.0.40
codegen_flags: <defaults>
</compile_context>

<pallas_src>
import functools

import jax
import jax.numpy as jnp
from jax.experimental import pallas as pl
from jax.experimental.pallas import tpu as pltpu

EPS = 1e-5

# ~2 MiB per x block (in the input dtype).  Mem-bound elementwise kernels hit
# the HBM-roofline plateau (~85%) at ~1-4 MiB blocks; with double-buffered
# in + out this keeps the working set well inside every generation's scoped
# VMEM once vmem_limit_bytes is raised.
_BLOCK_BYTES = 2 << 20
# Raised scoped-VMEM limit: helps v5e (16 MiB default), matches the v6e/v7x
# scoped default, stays inside v7x's 64 MiB physical VMEM.
_VMEM_LIMIT_BYTES = 32 << 20


def _round_down_mult(v, m):
    return (v // m) * m


def _cparams(*semantics):
    return pltpu.CompilerParams(dimension_semantics=semantics,
                                vmem_limit_bytes=_VMEM_LIMIT_BYTES)


def _row_tile(nrows, width, itemsize, block_bytes):
    """Rows per block for a (rows, width) array whose width is not tiled."""
    rows = block_bytes // max(width * itemsize, 1)
    rows = _round_down_mult(min(rows, nrows), 8)
    if rows <= 0:
        # TODO(synk): rows wider than the block budget would need a
        #             reduction-axis grid; not needed for this module.
        rows = min(nrows, 8)
    if rows >= nrows:
        rows = nrows
    return rows


def _tile_2d(nrows, ncols, itemsize, block_bytes):
    """(r_blk, c_blk) for a 2-D elementwise / column-reduce kernel, honoring
    the (8, 128) block constraint and a per-block byte budget."""
    if 8 * ncols * itemsize <= block_bytes:
        c_blk = ncols
        r_blk = _round_down_mult(min(nrows, block_bytes // (ncols * itemsize)), 8)
        if r_blk <= 0 or r_blk >= nrows:
            r_blk = nrows
    else:
        r_blk = 8 if nrows >= 8 else nrows
        c_blk = _round_down_mult(min(ncols, block_bytes // (r_blk * itemsize)), 128)
        if c_blk <= 0 or c_blk >= ncols:
            c_blk = ncols
    return r_blk, c_blk


# ----------------------------------------------------------------------------
# Kernels
# ----------------------------------------------------------------------------
def _layernorm_kernel(x_ref, g_ref, b_ref, o_ref):
    # Generic path: x block (tile_r, F); per-row reduction over lanes.
    x = x_ref[...].astype(jnp.float32)
    g = g_ref[...].astype(jnp.float32)          # (1, F), resident across steps
    b = b_ref[...].astype(jnp.float32)          # (1, F)
    mean = jnp.mean(x, axis=-1, keepdims=True)
    xc = x - mean
    var = jnp.mean(xc * xc, axis=-1, keepdims=True)     # biased variance
    scale = jax.lax.rsqrt(var + EPS) * g
    o_ref[...] = (xc * scale + b).astype(o_ref.dtype)


def _layernorm_packed_kernel(x_ref, g_ref, b_ref, m_ref, o_ref):
    # Lane-dense path for F < 128: each 128-lane row packs k = 128//F full
    # LayerNorm rows.  Segment (per original row) mean/variance come from a
    # resident block-diagonal averaging matrix on the (otherwise idle) MXU,
    # so every load/store stays a dense 128-lane access (no masked vst).
    x = x_ref[...].astype(jnp.float32)          # (tile_rp, 128)
    g = g_ref[...].astype(jnp.float32)          # (1, 128)  gamma tiled k times
    b = b_ref[...].astype(jnp.float32)          # (1, 128)  beta tiled k times
    m = m_ref[...]                              # (128, 128) block-diag(1/F)
    mean = jnp.dot(x, m, preferred_element_type=jnp.float32,
                   precision=jax.lax.Precision.HIGHEST)
    xc = x - mean
    var = jnp.dot(xc * xc, m, preferred_element_type=jnp.float32,
                  precision=jax.lax.Precision.HIGHEST)   # biased variance
    scale = jax.lax.rsqrt(var + EPS) * g
    o_ref[...] = (xc * scale + b).astype(o_ref.dtype)


def _batchnorm3d_kernel(x_ref, g_ref, b_ref, o_ref):
    # Single-pass BatchNorm1d on a native-layout (N, c_blk, L) block
    # (only used when L >= 128 and the block fits the byte budget).
    x = x_ref[...].astype(jnp.float32)
    g = g_ref[...].astype(jnp.float32)[None]    # (1, c_blk, 1)
    b = b_ref[...].astype(jnp.float32)[None]
    mean = jnp.mean(x, axis=(0, 2), keepdims=True)
    xc = x - mean
    var = jnp.mean(xc * xc, axis=(0, 2), keepdims=True)  # biased variance
    scale = jax.lax.rsqrt(var + EPS) * g
    o_ref[...] = (xc * scale + b).astype(o_ref.dtype)


def _batchnorm2d_kernel(x_ref, g_ref, b_ref, o_ref):
    # Single-pass BatchNorm1d on a (N, c_blk) block (channels on lanes).
    x = x_ref[...].astype(jnp.float32)
    g = g_ref[...].astype(jnp.float32)          # (1, c_blk)
    b = b_ref[...].astype(jnp.float32)
    mean = jnp.mean(x, axis=0, keepdims=True)
    xc = x - mean
    var = jnp.mean(xc * xc, axis=0, keepdims=True)       # biased variance
    scale = jax.lax.rsqrt(var + EPS) * g
    o_ref[...] = (xc * scale + b).astype(o_ref.dtype)


def _colstats_kernel(x_ref, sum_ref, sq_ref, *, n_rows, n_blk):
    # Two-pass BatchNorm, pass 1: per-column sum / sum-of-squares accumulated
    # across the (last, "arbitrary") row-block grid axis into resident f32
    # output blocks.
    r = pl.program_id(1)

    @pl.when(r == 0)
    def _init():
        sum_ref[...] = jnp.zeros_like(sum_ref)
        sq_ref[...] = jnp.zeros_like(sq_ref)

    x = x_ref[...].astype(jnp.float32)
    if n_rows % n_blk != 0:
        # Ragged last row block: zero out-of-bounds rows so they do not
        # pollute the column statistics.
        row = r * n_blk + jax.lax.broadcasted_iota(jnp.int32, x.shape, 0)
        x = jnp.where(row < n_rows, x, 0.0)
    sum_ref[...] += jnp.sum(x, axis=0, keepdims=True)
    sq_ref[...] += jnp.sum(x * x, axis=0, keepdims=True)


def _scale_shift_kernel(x_ref, s_ref, t_ref, o_ref):
    # Two-pass BatchNorm, pass 2: lane-dense y = x * scale + shift.
    x = x_ref[...].astype(jnp.float32)
    o_ref[...] = (x * s_ref[...] + t_ref[...]).astype(o_ref.dtype)


# ----------------------------------------------------------------------------
# Wrappers
# ----------------------------------------------------------------------------
def layer_norm(x, gamma, beta, *, block_bytes=_BLOCK_BYTES):
    """nn.LayerNorm(filters): normalize over the last dim (eps=1e-5)."""
    F = x.shape[-1]
    lead = x.shape[:-1]
    x2 = x.reshape((-1, F))                     # contiguous reshape: free
    R = x2.shape[0]
    itemsize = x2.dtype.itemsize

    # --- lane-dense packed path for small F (biggest store-path lever) -----
    if F < 128 and 128 % F == 0 and R % (128 // F) == 0:
        k = 128 // F
        rp = R // k
        xp = x2.reshape((rp, k * F))            # contiguous reshape: free
        gp = jnp.tile(gamma.astype(jnp.float32), k).reshape((1, k * F))
        bp = jnp.tile(beta.astype(jnp.float32), k).reshape((1, k * F))
        seg = jnp.arange(k * F, dtype=jnp.int32) // F
        mmat = (seg[:, None] == seg[None, :]).astype(jnp.float32) / float(F)
        tile_rp = _row_tile(rp, k * F, itemsize, block_bytes)
        out = pl.pallas_call(
            _layernorm_packed_kernel,
            out_shape=jax.ShapeDtypeStruct((rp, k * F), x.dtype),
            grid=(pl.cdiv(rp, tile_rp),),
            in_specs=[
                pl.BlockSpec((tile_rp, k * F), lambda i: (i, 0)),
                pl.BlockSpec((1, k * F), lambda i: (0, 0)),      # gamma, resident
                pl.BlockSpec((1, k * F), lambda i: (0, 0)),      # beta, resident
                pl.BlockSpec((k * F, k * F), lambda i: (0, 0)),  # seg matrix
            ],
            out_specs=pl.BlockSpec((tile_rp, k * F), lambda i: (i, 0)),
            compiler_params=_cparams("parallel"),
        )(xp, gp, bp, mmat)
        return out.reshape(lead + (F,))

    # --- generic row-tiled path --------------------------------------------
    tile_r = _row_tile(R, F, itemsize, block_bytes)
    g2 = gamma.reshape((1, F))
    b2 = beta.reshape((1, F))
    out = pl.pallas_call(
        _layernorm_kernel,
        out_shape=jax.ShapeDtypeStruct((R, F), x.dtype),
        grid=(pl.cdiv(R, tile_r),),
        in_specs=[
            pl.BlockSpec((tile_r, F), lambda i: (i, 0)),
            pl.BlockSpec((1, F), lambda i: (0, 0)),
            pl.BlockSpec((1, F), lambda i: (0, 0)),
        ],
        out_specs=pl.BlockSpec((tile_r, F), lambda i: (i, 0)),
        compiler_params=_cparams("parallel"),
    )(x2, g2, b2)
    return out.reshape(lead + (F,))


def _batch_norm_two_pass(x2, gamma, beta, *, spatial, block_bytes):
    """Two-pass BatchNorm on the flattened, lane-dense (N, C*L) view."""
    N, W = x2.shape
    C = gamma.shape[0]
    itemsize = x2.dtype.itemsize
    count = N * spatial
    n_blk, w_blk = _tile_2d(N, W, itemsize, block_bytes)

    # Pass 1: per-column sum / sum-of-squares (reduction axis last).
    col_sum, col_sq = pl.pallas_call(
        functools.partial(_colstats_kernel, n_rows=N, n_blk=n_blk),
        out_shape=(jax.ShapeDtypeStruct((1, W), jnp.float32),
                   jax.ShapeDtypeStruct((1, W), jnp.float32)),
        grid=(pl.cdiv(W, w_blk), pl.cdiv(N, n_blk)),
        in_specs=[pl.BlockSpec((n_blk, w_blk), lambda j, r: (r, j))],
        out_specs=(pl.BlockSpec((1, w_blk), lambda j, r: (0, j)),
                   pl.BlockSpec((1, w_blk), lambda j, r: (0, j))),
        compiler_params=_cparams("parallel", "arbitrary"),
    )(x2)

    # Tiny O(C*L) per-channel finalize (negligible vs the O(N*C*L) passes).
    ch_sum = col_sum.reshape((C, spatial)).sum(axis=1)
    ch_sq = col_sq.reshape((C, spatial)).sum(axis=1)
    mean = ch_sum / count
    # TODO(synk): E[x^2] - mean^2 in f32; switch to a centered second stats
    #             pass if extreme mean/std ratios ever matter.
    var = jnp.maximum(ch_sq / count - mean * mean, 0.0)   # biased variance
    scale = gamma.astype(jnp.float32) * jax.lax.rsqrt(var + EPS)
    shift = beta.astype(jnp.float32) - mean * scale
    scale_cols = jnp.repeat(scale, spatial).reshape((1, W))
    shift_cols = jnp.repeat(shift, spatial).reshape((1, W))

    # Pass 2: lane-dense elementwise normalize.
    return pl.pallas_call(
        _scale_shift_kernel,
        out_shape=jax.ShapeDtypeStruct((N, W), x2.dtype),
        grid=(pl.cdiv(N, n_blk), pl.cdiv(W, w_blk)),
        in_specs=[
            pl.BlockSpec((n_blk, w_blk), lambda i, j: (i, j)),
            pl.BlockSpec((1, w_blk), lambda i, j: (0, j)),
            pl.BlockSpec((1, w_blk), lambda i, j: (0, j)),
        ],
        out_specs=pl.BlockSpec((n_blk, w_blk), lambda i, j: (i, j)),
        compiler_params=_cparams("parallel", "parallel"),
    )(x2, scale_cols, shift_cols)


def batch_norm1d(x, gamma, beta, *, block_bytes=_BLOCK_BYTES):
    """Training-mode nn.BatchNorm1d forward on (N, C) or (N, C, L)."""
    # TODO(synk): running_mean / running_var (momentum=0.1) are not updated.
    C = gamma.shape[0]
    itemsize = x.dtype.itemsize

    if x.ndim == 3:
        N, Cx, L = x.shape
        assert Cx == C, "channel dim mismatch"
        slab = N * L * itemsize                 # bytes of one channel's data
        # Single-pass fast path: lane-dense spatial dim AND the (N, c_blk, L)
        # block fits the VMEM byte budget.
        if L >= 128 and min(C, 8) * slab <= block_bytes:
            if C * slab <= block_bytes:
                c_blk = C
            else:
                c_blk = min(C, max(8, _round_down_mult(block_bytes // slab, 8)))
            g2 = gamma.reshape((C, 1))
            b2 = beta.reshape((C, 1))
            return pl.pallas_call(
                _batchnorm3d_kernel,
                out_shape=jax.ShapeDtypeStruct((N, C, L), x.dtype),
                grid=(pl.cdiv(C, c_blk),),
                in_specs=[
                    pl.BlockSpec((N, c_blk, L), lambda c: (0, c, 0)),
                    pl.BlockSpec((c_blk, 1), lambda c: (c, 0)),
                    pl.BlockSpec((c_blk, 1), lambda c: (c, 0)),
                ],
                out_specs=pl.BlockSpec((N, c_blk, L), lambda c: (0, c, 0)),
                compiler_params=_cparams("parallel"),
            )(x, g2, b2)
        # Otherwise: two-pass on the flattened (N, C*L) view -- lane-dense
        # whenever C*L >= 128 (fixes masked stores for small L), fits VMEM for
        # any N*C*L, and yields a multi-block grid for v7x's two TensorCores.
        y = _batch_norm_two_pass(x.reshape((N, C * L)), gamma, beta,
                                 spatial=L, block_bytes=block_bytes)
        return y.reshape((N, C, L))

    if x.ndim == 2:
        N, Cx = x.shape
        assert Cx == C, "channel dim mismatch"
        col_bytes = N * itemsize
        c_blk = 0
        if N * C * itemsize <= block_bytes:
            c_blk = C
        elif C >= 128 and 128 * col_bytes <= block_bytes:
            c_blk = min(C, _round_down_mult(block_bytes // col_bytes, 128))
        if c_blk > 0:
            g2 = gamma.reshape((1, C))
            b2 = beta.reshape((1, C))
            return pl.pallas_call(
                _batchnorm2d_kernel,
                out_shape=jax.ShapeDtypeStruct((N, C), x.dtype),
                grid=(pl.cdiv(C, c_blk),),
                in_specs=[
                    pl.BlockSpec((N, c_blk), lambda c: (0, c)),
                    pl.BlockSpec((1, c_blk), lambda c: (0, c)),
                    pl.BlockSpec((1, c_blk), lambda c: (0, c)),
                ],
                out_specs=pl.BlockSpec((N, c_blk), lambda c: (0, c)),
                compiler_params=_cparams("parallel"),
            )(x, g2, b2)
        # Huge N (or huge N*C): two-pass so the row axis can be tiled too.
        return _batch_norm_two_pass(x, gamma, beta, spatial=1,
                                    block_bytes=block_bytes)

    raise ValueError("BatchNorm1d expects (N, C) or (N, C, L) input")


class Normalization:
    """JAX/Pallas port of the PyTorch `Normalization` module (forward pass)."""

    def __init__(self, norm, filters):
        self.kind = norm
        self.filters = filters
        if norm in ("batch", "layer"):
            # PyTorch default affine init: weight = 1, bias = 0.
            self.gamma = jnp.ones((filters,), dtype=jnp.float32)
            self.beta = jnp.zeros((filters,), dtype=jnp.float32)
        elif norm is None:
            self.gamma = None
            self.beta = None
        else:
            raise ValueError(str(norm) + " is not a valid normalization")

    def __call__(self, x):
        if self.kind == "batch":
            return batch_norm1d(x, self.gamma, self.beta)
        if self.kind == "layer":
            return layer_norm(x, self.gamma, self.beta)
        # nn.Identity(): returning x is free -- no kernel, no HBM traffic.
        return x


# ----------------------------------------------------------------------------
# Reference implementations (plain JAX) for sanity checks
# ----------------------------------------------------------------------------
def _ref_layer_norm(x, g, b):
    m = jnp.mean(x, axis=-1, keepdims=True)
    v = jnp.mean((x - m) ** 2, axis=-1, keepdims=True)
    return (x - m) * jax.lax.rsqrt(v + EPS) * g + b


def _ref_batch_norm3d(x, g, b):
    m = jnp.mean(x, axis=(0, 2), keepdims=True)
    v = jnp.mean((x - m) ** 2, axis=(0, 2), keepdims=True)
    return (x - m) * jax.lax.rsqrt(v + EPS) * g[None, :, None] + b[None, :, None]


def _ref_batch_norm2d(x, g, b):
    m = jnp.mean(x, axis=0, keepdims=True)
    v = jnp.mean((x - m) ** 2, axis=0, keepdims=True)
    return (x - m) * jax.lax.rsqrt(v + EPS) * g[None, :] + b[None, :]


if __name__ == "__main__":
    key = jax.random.PRNGKey(0)
    ks = jax.random.split(key, 6)

    bn = Normalization("batch", 4)

    # BatchNorm1d, (N, C, L) with L < 128 -> lane-dense two-pass path.
    x = jax.random.normal(ks[0], (2, 4, 16), dtype=jnp.float32)
    y = jax.block_until_ready(bn(x))
    assert jnp.allclose(y, _ref_batch_norm3d(x, bn.gamma, bn.beta), atol=1e-4)

    # BatchNorm1d, (N, C, L) with L = 128 -> single-pass native-layout path.
    x = jax.random.normal(ks[1], (2, 4, 128), dtype=jnp.float32)
    y = jax.block_until_ready(bn(x))
    assert jnp.allclose(y, _ref_batch_norm3d(x, bn.gamma, bn.beta), atol=1e-4)

    # BatchNorm1d, (N, C) -> single-pass 2-D path.
    x = jax.random.normal(ks[2], (8, 4), dtype=jnp.float32)
    y = jax.block_until_ready(bn(x))
    assert jnp.allclose(y, _ref_batch_norm2d(x, bn.gamma, bn.beta), atol=1e-4)

    # LayerNorm, F = 32 < 128 -> packed lane-dense path (MXU segment stats).
    ln = Normalization("layer", 32)
    x = jax.random.normal(ks[3], (2, 8, 32), dtype=jnp.float32)
    y = jax.block_until_ready(ln(x))
    # Tolerance leaves margin for reduced-precision f32 MXU passes; expected
    # error with Precision.HIGHEST is ~1e-6.
    assert jnp.allclose(y, _ref_layer_norm(x, ln.gamma, ln.beta), atol=5e-3)

    # LayerNorm, F = 256 -> generic row-tiled path.
    ln2 = Normalization("layer", 256)
    x = jax.random.normal(ks[4], (2, 4, 256), dtype=jnp.float32)
    y = jax.block_until_ready(ln2(x))
    assert jnp.allclose(y, _ref_layer_norm(x, ln2.gamma, ln2.beta), atol=1e-4)

    # Identity branch: no kernel launched.
    x = jax.random.normal(ks[5], (2, 4, 16), dtype=jnp.float32)
    idn = Normalization(None, 4)
    assert jnp.allclose(idn(x), x)

    print("KERNEL_OK")
</pallas_src>

<mosaic_0001>
module attributes {stable_mosaic.version = 11 : i64} {
  func.func @_colstats_kernel(%arg0: i32, %arg1: i32, %arg2: memref<2x64xf32, #tpu.memory_space<vmem>>, %arg3: memref<1x64xf32, #tpu.memory_space<vmem>>, %arg4: memref<1x64xf32, #tpu.memory_space<vmem>>) attributes {dimension_semantics = [#tpu.dimension_semantics<parallel>, #tpu.dimension_semantics<arbitrary>], iteration_bounds = array<i64: 1, 1>, scalar_prefetch = 0 : i64, scratch_operands = 0 : i64, tpu.core_type = #tpu.core_type<tc>, window_params = [{transform_indices = @transform_0, window_bounds = array<i64: 2, 64>}, {transform_indices = @transform_1, window_bounds = array<i64: 1, 64>}, {transform_indices = @transform_2, window_bounds = array<i64: 1, 64>}]} {
    %c0_i32 = arith.constant 0 : i32
    %0 = arith.cmpi eq, %arg1, %c0_i32 : i32
    %1 = arith.extui %0 : i1 to i32
    %c0_i32_0 = arith.constant 0 : i32
    %2 = arith.cmpi ne, %1, %c0_i32_0 : i32
    scf.if %2 {
      %cst_11 = arith.constant 0.000000e+00 : f32
      %15 = vector.broadcast %cst_11 : f32 to vector<1x64xf32>
      %c0_12 = arith.constant 0 : index
      %c0_13 = arith.constant 0 : index
      %16 = vector.load %arg3[%c0_12, %c0_13] : memref<1x64xf32, #tpu.memory_space<vmem>>, vector<1x64xf32>
      tpu.vector_store %arg3[%c0_12, %c0_13], %15 {strides = array<i32>} : memref<1x64xf32, #tpu.memory_space<vmem>>, vector<1x64xf32>,
      %cst_14 = arith.constant 0.000000e+00 : f32
      %17 = vector.broadcast %cst_14 : f32 to vector<1x64xf32>
      %c0_15 = arith.constant 0 : index
      %c0_16 = arith.constant 0 : index
      %18 = vector.load %arg4[%c0_15, %c0_16] : memref<1x64xf32, #tpu.memory_space<vmem>>, vector<1x64xf32>
      tpu.vector_store %arg4[%c0_15, %c0_16], %17 {strides = array<i32>} : memref<1x64xf32, #tpu.memory_space<vmem>>, vector<1x64xf32>,
    } else {
    }
    %c0 = arith.constant 0 : index
    %c0_1 = arith.constant 0 : index
    %3 = vector.load %arg2[%c0, %c0_1] : memref<2x64xf32, #tpu.memory_space<vmem>>, vector<2x64xf32>
    %c0_2 = arith.constant 0 : index
    %c0_3 = arith.constant 0 : index
    %4 = vector.load %arg3[%c0_2, %c0_3] : memref<1x64xf32, #tpu.memory_space<vmem>>, vector<1x64xf32>
    %cst = arith.constant dense<0.000000e+00> : vector<64xf32>
    %5 = vector.multi_reduction <add>, %3, %cst [0] : vector<2x64xf32> to vector<64xf32>
    %6 = vector.shape_cast %5 : vector<64xf32> to vector<1x64xf32>
    %7 = arith.addf %4, %6 : vector<1x64xf32>
    %c0_4 = arith.constant 0 : index
    %c0_5 = arith.constant 0 : index
    %8 = vector.load %arg3[%c0_4, %c0_5] : memref<1x64xf32, #tpu.memory_space<vmem>>, vector<1x64xf32>
    tpu.vector_store %arg3[%c0_4, %c0_5], %7 {strides = array<i32>} : memref<1x64xf32, #tpu.memory_space<vmem>>, vector<1x64xf32>,
    %c0_6 = arith.constant 0 : index
    %c0_7 = arith.constant 0 : index
    %9 = vector.load %arg4[%c0_6, %c0_7] : memref<1x64xf32, #tpu.memory_space<vmem>>, vector<1x64xf32>
    %10 = arith.mulf %3, %3 : vector<2x64xf32>
    %cst_8 = arith.constant dense<0.000000e+00> : vector<64xf32>
    %11 = vector.multi_reduction <add>, %10, %cst_8 [0] : vector<2x64xf32> to vector<64xf32>
    %12 = vector.shape_cast %11 : vector<64xf32> to vector<1x64xf32>
    %13 = arith.addf %9, %12 : vector<1x64xf32>
    %c0_9 = arith.constant 0 : index
    %c0_10 = arith.constant 0 : index
    %14 = vector.load %arg4[%c0_9, %c0_10] : memref<1x64xf32, #tpu.memory_space<vmem>>, vector<1x64xf32>
    tpu.vector_store %arg4[%c0_9, %c0_10], %13 {strides = array<i32>} : memref<1x64xf32, #tpu.memory_space<vmem>>, vector<1x64xf32>,
    return
  }
  func.func @transform_0(%arg0: i32, %arg1: i32) -> (i32, i32) {
    %c0_i32 = arith.constant 0 : i32
    return %arg1, %arg0 : i32, i32
  }
  func.func @transform_1(%arg0: i32, %arg1: i32) -> (i32, i32) {
    %c0_i32 = arith.constant 0 : i32
    %c0_i32_0 = arith.constant 0 : i32
    return %c0_i32, %arg0 : i32, i32
  }
  func.func @transform_2(%arg0: i32, %arg1: i32) -> (i32, i32) {
    %c0_i32 = arith.constant 0 : i32
    %c0_i32_0 = arith.constant 0 : i32
    return %c0_i32, %arg0 : i32, i32
  }
}

</mosaic_0001>

<bundles_post_ra>
// kernel: tpu_custom_call.1
= control target key start
LH: loop header
LB: loop body
LE: loop exit
PB: predicated region body
PF: predicated region fallthrough
CT: control target
= control target key end

     0   :  { %8 = vsyncpa [#allocation3], 0  ;;  %s227_s0 = inlined_call_operand.hbm [shape: f32[2,64], index: 0, kind: input, shape index: {}]   ;;  %s228_s1 = inlined_call_operand.hbm [shape: f32[1,64], index: 1, kind: output, shape index: {0}]   ;;  %s229_s2 = inlined_call_operand.hbm [shape: f32[1,64], index: 2, kind: output, shape index: {1}]  }
   0x1   :  { %9 = vsyncpa [#allocation4], 0 }
   0x2   :  { %10 = vsyncpa [#allocation7], 0  ;;  %s160_s9 = smov [#allocation2]   ;;  %s88_s13 = scalar_lea.hbm %s227_s0, 32 }
   0x3   :  { %s17_s10 = sshll.u32 %s160_s9, 4  ;;  %p89_p0 = scmp.ne.s32.totalorder %s227_s0, %s88_s13  ;;  %s18_s10 = int_to_ptr.vmem [resolvable:$true] %s17_s10 }
   0x4   :  { %p92_p1 = scmp.lt.u32.totalorder %s88_s13, %s227_s0 }
   0x6   :  { %p94_p2 = pnand %p92_p1, %p89_p0 }
   0x8   :  { %97 = shalt.err (!%p94_p2)
}
   0x9   :  { %s98_s18 = scalar_lea.vmem %s18_s10, 32  ;;  %p103_p4 = scmp.lt.s32.totalorder %s18_s10, %s18_s10 }
   0xa   :  { %p99_p3 = scmp.ne.s32.totalorder %s18_s10, %s98_s18  ;;  %p104_p5 = scmp.lt.s32.totalorder %s98_s18, %s98_s18 }
   0xc   :  { %p105_p6 = por %p104_p5, %p103_p4 }
   0xe   :  { %p106_p7 = pnand %p105_p6, %p99_p3 }
  0x10   :  { %109 = shalt.err (!%p106_p7)
}
  0x11   :  { %20 = dma.hbm_to_vmem [thread:$0]  %s227_s0, 32, %s18_s10, [#allocation3]  }
  0x12   :  { %154 = dma.done.wait [#allocation3], 32  }
  0x13   :  { %155 = vsyncadd [#allocation3], 4294967264  ;;  %vm28_vm0 = vcmask 516096   ;;  %v161_v0 = vmov 0.0   ;;  %vm33_vm1 = vcmask 517120   ;;  %s162_s0 = smov [#allocation5]  }
  0x14   :  { %29 = vst.msk [vmem:[#allocation5] sm:$0x1] %vm28_vm0, %v161_v0  ;;  %30 = vst.msk [vmem:[#allocation6] sm:$0x1] %vm28_vm0, %v161_v0  ;;  %v31_v1 = vld [vmem:[#allocation2] sm:$0x3] }
  0x15   :  { %v34_v2 = vsel %vm33_vm1, %v31_v1, 0.0  ;;  %v45_v3 = vmul.f32 %v31_v1, %v31_v1  ;;  %s61_s21 = sshll.u32 %s162_s0, 4  ;;  %s163_s22 = smov [#allocation6]   ;;  %s62_s21 = int_to_ptr.vmem [resolvable:$true] %s61_s21 }
  0x16   :  { %v35_v4 = vrot.slane %v34_v2, 4  ;;  %s71_s23 = sshll.u32 %s163_s22, 4  ;;  %s110_s24 = scalar_lea.vmem %s62_s21, 16  ;;  %s194_s23 = int_to_ptr.vmem [resolvable:$true] %s71_s23 }
  0x17   :  { %v46_v5 = vsel %vm33_vm1, %v45_v3, 0.0  ;;  %p111_p8 = scmp.ne.s32.totalorder %s62_s21, %s110_s24  ;;  %s114_s25 = scalar_lea.vmem %s62_s21, 32 }
  0x18   :  { %v36_v6 = vadd.f32 %v35_v4, %v34_v2  ;;  %v47_v7 = vrot.slane %v46_v5, 4  ;;  %p115_p9 = scmp.lt.s32.totalorder %s62_s21, %s62_s21  ;;  %p116_p10 = scmp.lt.s32.totalorder %s114_s25, %s110_s24 }
  0x1a   :  { %v37_v8 = vrot.slane %v36_v6, 2  ;;  %v48_v9 = vadd.f32 %v47_v7, %v46_v5  ;;  %p117_p11 = por %p116_p10, %p115_p9 }
  0x1b   :  { %v32_v14 = vld [vmem:[#allocation5] sm:$0x1]  ;;  %v44_v17 = vld [vmem:[#allocation6] sm:$0x1] }
  0x1c   :  { %v38_v10 = vadd.f32 %v37_v8, %v36_v6  ;;  %v49_v11 = vrot.slane %v48_v9, 2  ;;  %p118_p12 = pnand %p117_p11, %p111_p8 }
  0x1e   :  { %v39_v12 = vrot.slane %v38_v10, 1  ;;  %v50_v13 = vadd.f32 %v49_v11, %v48_v9 }
  0x20   :  { %v40_v15 = vadd.f32 %v39_v12, %v38_v10  ;;  %v51_v16 = vrot.slane %v50_v13, 1 }
  0x22   :  { %v41_v18 = vadd.f32 %v40_v15, %v32_v14  ;;  %v52_v19 = vadd.f32 %v51_v16, %v50_v13 }
  0x24   :  { %43 = vst.msk [vmem:[#allocation5] sm:$0x1] %vm28_vm0, %v41_v18  ;;  %v53_v20 = vadd.f32 %v52_v19, %v44_v17 }
  0x25   :  { %121 = shalt.err (!%p118_p12)
}
  0x26   :  { %s122_s28 = scalar_lea.hbm %s228_s1, 16 }
  0x27   :  { %p123_p13 = scmp.ne.s32.totalorder %s228_s1, %s122_s28  ;;  %p126_p0 = scmp.lt.u32.totalorder %s122_s28, %s228_s1 }
  0x29   :  { %p128_p1 = pnand %p126_p0, %p123_p13 }
  0x2b   :  { %131 = shalt.err (!%p128_p1)
}
  0x2c   :  { %64 = dma.vmem_to_hbm [thread:$0]  %s62_s21, 16, %s228_s1, [#allocation4]   ;;  %54 = vst.msk [vmem:[#allocation6] sm:$0x1] %vm28_vm0, %v53_v20 }
  0x2d   :  { %s132_s7 = scalar_lea.vmem %s194_s23, 16  ;;  %s136_s8 = scalar_lea.vmem %s194_s23, 32 }
  0x2e   :  { %p133_p2 = scmp.ne.s32.totalorder %s194_s23, %s132_s7  ;;  %p137_p3 = scmp.lt.s32.totalorder %s194_s23, %s194_s23 }
  0x2f   :  { %p138_p4 = scmp.lt.s32.totalorder %s136_s8, %s132_s7 }
  0x31   :  { %p139_p5 = por %p138_p4, %p137_p3 }
  0x33   :  { %p140_p6 = pnand %p139_p5, %p133_p2 }
  0x35   :  { %143 = shalt.err (!%p140_p6)
}
  0x36   :  { %s144_s11 = scalar_lea.hbm %s229_s2, 16 }
  0x37   :  { %p145_p7 = scmp.ne.s32.totalorder %s229_s2, %s144_s11  ;;  %p148_p8 = scmp.lt.u32.totalorder %s144_s11, %s229_s2 }
  0x39   :  { %p150_p9 = pnand %p148_p8, %p145_p7 }
  0x3b   :  { %153 = shalt.err (!%p150_p9)
}
  0x3c   :  { %74 = dma.vmem_to_hbm [thread:$0]  %s194_s23, 16, %s229_s2, [#allocation7]  }
  0x3d   :  { %156 = dma.done.wait [#allocation4], 16  }
  0x3e   :  { %157 = vsyncadd [#allocation4], 4294967280 }
  0x3f   :  { %158 = dma.done.wait [#allocation7], 16  }
  0x40   :  { %159 = vsyncadd [#allocation7], 4294967280 }
  0x41   :  { %81 = vsyncpa [#allocation3], 1 }
  0x42   :  { %82 = vsyncpa [#allocation4], 1 }
  0x43   :  { %83 = vsyncpa [#allocation7], 1 }

</bundles_post_ra>
